<compile_context>
chip_gen: v5e
topology: v5e:2x2
jax: 0.10.0
libtpu: 0.0.40
codegen_flags: <defaults>
</compile_context>

<pallas_src>
import functools

import jax
import jax.numpy as jnp
from jax.experimental import pallas as pl
from jax.experimental.pallas import tpu as pltpu


def _round_up(x, m):
    return (x + m - 1) // m * m


def _rpn_heads_kernel(x_ref, w_ref, b_ref, o_ref):
    """One (image, HW-tile) step: fused cls+bbox 1x1-conv as a single MXU matmul."""
    # x_ref: (1, Cin, T)   input tile, lane axis = spatial (native channel-major)
    # w_ref: (CT, Cin)     fused [cls | bbox] weights (bf16), rows sublane-padded
    # b_ref: (CT, 1)       fused biases, fp32
    # o_ref: (1, CT, T)    fused padded output tile
    x = x_ref[0].astype(w_ref.dtype)                      # in-VMEM cast -> bf16 MXU path
    acc = jnp.dot(w_ref[...], x,
                  preferred_element_type=jnp.float32)     # (CT, T), K = Cin, fp32 acc
    o_ref[0] = (acc + b_ref[...]).astype(o_ref.dtype)     # lane-broadcast bias, one store


def pack_rpn_head_params(w_cls, b_cls, w_box, b_box, compute_dtype=jnp.bfloat16):
    """One-time packing of the two 1x1-conv heads into a fused, sublane-aligned
    (CT, Cin) weight block and (CT, 1) fp32 bias block.  Call once at model init
    (hoisted off the per-forward critical path)."""
    c_cls, cin = int(w_cls.shape[0]), int(w_cls.shape[1])
    c_box = int(w_box.shape[0])
    cls_pad = _round_up(c_cls, 8)              # 18 -> 24
    box_pad = _round_up(c_box, 8)              # 36 -> 40
    ct = cls_pad + box_pad                     # 64

    w = jnp.zeros((ct, cin), compute_dtype)
    w = w.at[:c_cls].set(w_cls.reshape(c_cls, cin).astype(compute_dtype))
    w = w.at[cls_pad:cls_pad + c_box].set(w_box.reshape(c_box, cin).astype(compute_dtype))

    b = jnp.zeros((ct, 1), jnp.float32)
    b = b.at[:c_cls, 0].set(b_cls.astype(jnp.float32))
    b = b.at[cls_pad:cls_pad + c_box, 0].set(b_box.astype(jnp.float32))

    meta = dict(c_cls=c_cls, cls_pad=cls_pad, c_box=c_box, box_pad=box_pad,
                ct=ct, cin=cin)
    return w, b, meta


def _select_tile_and_vmem(hw, cin, ct, x_itemsize, out_itemsize, w_bytes, b_bytes):
    """Generation-aware HW tile: biggest lane tile whose double-buffered input +
    output blocks fit in ~half the chip's VMEM (safe on v7x's 64 MiB)."""
    try:
        info = pltpu.get_tpu_info()
        vmem_cap = int(getattr(info, "vmem_capacity_bytes", 64 << 20))
    except Exception:
        vmem_cap = 64 << 20                                # conservative (v7x) fallback
    budget = vmem_cap // 2
    bytes_per_lane = 2 * (cin * x_itemsize + ct * out_itemsize)   # x2 = double buffering
    tile_cap = max(128, (budget - w_bytes - b_bytes) // bytes_per_lane // 128 * 128)
    tile_cap = min(tile_cap, 16 * 1024)                    # diminishing returns beyond 16K
    hw_lane = _round_up(hw, 128)
    tile = int(min(tile_cap, hw_lane))
    hw_total = _round_up(hw, tile)
    vmem_need = tile * bytes_per_lane + w_bytes + b_bytes + (4 << 20)
    vmem_limit = int(min(vmem_cap, max(vmem_need, 32 << 20)))
    return tile, hw_total, vmem_limit


def rpn_forward(x_nchw, w_fused, b_fused, meta):
    """Equivalent of RPN.forward: (Conv2d(256,18,1)(x), Conv2d(256,36,1)(x))."""
    n, cin, h, w_sp = x_nchw.shape
    hw = h * w_sp
    ct = meta["ct"]
    assert cin == meta["cin"]

    out_dtype = x_nchw.dtype
    x_itemsize = jnp.dtype(x_nchw.dtype).itemsize
    out_itemsize = jnp.dtype(out_dtype).itemsize
    w_bytes = w_fused.size * jnp.dtype(w_fused.dtype).itemsize
    b_bytes = b_fused.size * jnp.dtype(b_fused.dtype).itemsize

    tile, hw_total, vmem_limit = _select_tile_and_vmem(
        hw, cin, ct, x_itemsize, out_itemsize, w_bytes, b_bytes)

    # Channel-major, lane-dense view of the input (free reshape, no transpose).
    x2 = x_nchw.reshape(n, cin, hw)
    if hw_total != hw:
        # Remainder tile: pad the lane axis so every block store stays full-width
        # and unmasked (only happens when HW is not a multiple of the tile).
        x2 = jnp.pad(x2, ((0, 0), (0, 0), (0, hw_total - hw)))

    grid = (n, hw_total // tile)

    out = pl.pallas_call(
        _rpn_heads_kernel,
        out_shape=jax.ShapeDtypeStruct((n, ct, hw_total), out_dtype),
        grid_spec=pltpu.PrefetchScalarGridSpec(
            num_scalar_prefetch=0,
            grid=grid,
            in_specs=[
                pl.BlockSpec((1, cin, tile), lambda ni, ti: (ni, 0, ti)),
                pl.BlockSpec((ct, cin), lambda ni, ti: (0, 0)),
                pl.BlockSpec((ct, 1), lambda ni, ti: (0, 0)),
            ],
            out_specs=pl.BlockSpec((1, ct, tile), lambda ni, ti: (ni, 0, ti)),
        ),
        compiler_params=pltpu.CompilerParams(
            dimension_semantics=("parallel", "parallel"),
            vmem_limit_bytes=vmem_limit),
    )(x2, w_fused, b_fused)

    # Strip lane padding + sublane (head) padding; restore NCHW spatial dims.
    out = out[:, :, :hw]
    c_cls, cls_pad, c_box = meta["c_cls"], meta["cls_pad"], meta["c_box"]
    logits = out[:, :c_cls, :].reshape(n, c_cls, h, w_sp)
    bbox = out[:, cls_pad:cls_pad + c_box, :].reshape(n, c_box, h, w_sp)
    return logits, bbox


if __name__ == "__main__":
    key = jax.random.PRNGKey(0)
    k_x, k_wc, k_bc, k_wb, k_bb = jax.random.split(key, 5)

    # Cin is fixed at 256 by the module; keep spatial / batch small.
    N, Cin, H, W = 2, 256, 16, 16
    C_CLS, C_BOX = 9 * 2, 9 * 4     # 18, 36

    x = jax.random.normal(k_x, (N, Cin, H, W), dtype=jnp.float32)
    # PyTorch Conv2d(256, Cout, 1) parameter shapes: (Cout, 256, 1, 1), (Cout,)
    w_cls = jax.random.normal(k_wc, (C_CLS, Cin, 1, 1), dtype=jnp.float32) * 0.1
    b_cls = jax.random.normal(k_bc, (C_CLS,), dtype=jnp.float32) * 0.1
    w_box = jax.random.normal(k_wb, (C_BOX, Cin, 1, 1), dtype=jnp.float32) * 0.1
    b_box = jax.random.normal(k_bb, (C_BOX,), dtype=jnp.float32) * 0.1

    # One-time packing (model init), hoisted off the per-call critical path.
    w_fused, b_fused, meta = pack_rpn_head_params(
        w_cls, b_cls, w_box, b_box, compute_dtype=jnp.bfloat16)

    fwd = jax.jit(functools.partial(rpn_forward, meta=meta))
    logits, bbox = fwd(x, w_fused, b_fused)
    logits = jax.block_until_ready(logits)
    bbox = jax.block_until_ready(bbox)

    # Reference (fp32, HIGHEST precision): a 1x1 conv is a channel matmul.
    ref_logits = jnp.einsum(
        "oc,nchw->nohw", w_cls.reshape(C_CLS, Cin), x,
        precision=jax.lax.Precision.HIGHEST) + b_cls[None, :, None, None]
    ref_bbox = jnp.einsum(
        "oc,nchw->nohw", w_box.reshape(C_BOX, Cin), x,
        precision=jax.lax.Precision.HIGHEST) + b_box[None, :, None, None]

    assert logits.shape == (N, C_CLS, H, W)
    assert bbox.shape == (N, C_BOX, H, W)
    # bf16 MXU path (fp32 accumulation): tolerance reflects bf16 input rounding.
    assert jnp.allclose(logits, ref_logits, atol=5e-2, rtol=5e-2), (
        float(jnp.max(jnp.abs(logits - ref_logits))))
    assert jnp.allclose(bbox, ref_bbox, atol=5e-2, rtol=5e-2), (
        float(jnp.max(jnp.abs(bbox - ref_bbox))))

    print("KERNEL_OK")
</pallas_src>

<mosaic_0001>
module attributes {stable_mosaic.version = 11 : i64} {
  func.func @_rpn_heads_kernel(%arg0: i32, %arg1: i32, %arg2: memref<1x256x256xf32, #tpu.memory_space<vmem>>, %arg3: memref<64x256xbf16, #tpu.memory_space<vmem>>, %arg4: memref<64x1xf32, #tpu.memory_space<vmem>>, %arg5: memref<1x64x256xf32, #tpu.memory_space<vmem>>) attributes {dimension_semantics = [#tpu.dimension_semantics<parallel>, #tpu.dimension_semantics<parallel>], iteration_bounds = array<i64: 2, 1>, scalar_prefetch = 0 : i64, scratch_operands = 0 : i64, tpu.core_type = #tpu.core_type<tc>, window_params = [{transform_indices = @transform_0, window_bounds = array<i64: 1, 256, 256>}, {pipeline_mode = #tpu.pipeline_mode<synchronous>, transform_indices = @transform_1, window_bounds = array<i64: 64, 256>}, {pipeline_mode = #tpu.pipeline_mode<synchronous>, transform_indices = @transform_2, window_bounds = array<i64: 64, 1>}, {transform_indices = @transform_3, window_bounds = array<i64: 1, 64, 256>}]} {
    %c0 = arith.constant 0 : index
    %c0_0 = arith.constant 0 : index
    %c0_1 = arith.constant 0 : index
    %0 = vector.load %arg2[%c0, %c0_0, %c0_1] : memref<1x256x256xf32, #tpu.memory_space<vmem>>, vector<1x256x256xf32>
    %1 = vector.shape_cast %0 : vector<1x256x256xf32> to vector<256x256xf32>
    %2 = arith.truncf %1 : vector<256x256xf32> to vector<256x256xbf16>
    %c0_2 = arith.constant 0 : index
    %c0_3 = arith.constant 0 : index
    %3 = vector.load %arg3[%c0_2, %c0_3] : memref<64x256xbf16, #tpu.memory_space<vmem>>, vector<64x256xbf16>
    %cst = arith.constant dense<0.000000e+00> : vector<64x256xf32>
    %4 = tpu.matmul %3, %2, %cst {dimension_numbers = #tpu.dot_dimension_numbers<[1], [0], [0], [1], [0, 0, 1, 1], [], []>} : vector<64x256xbf16>, vector<256x256xbf16>, vector<64x256xf32> -> vector<64x256xf32>
    %c0_4 = arith.constant 0 : index
    %c0_5 = arith.constant 0 : index
    %5 = vector.load %arg4[%c0_4, %c0_5] : memref<64x1xf32, #tpu.memory_space<vmem>>, vector<64x1xf32>
    %6 = vector.broadcast %5 : vector<64x1xf32> to vector<64x256xf32>
    %7 = arith.addf %4, %6 : vector<64x256xf32>
    %c0_6 = arith.constant 0 : index
    %c0_7 = arith.constant 0 : index
    %c0_8 = arith.constant 0 : index
    %8 = vector.load %arg5[%c0_6, %c0_7, %c0_8] : memref<1x64x256xf32, #tpu.memory_space<vmem>>, vector<1x64x256xf32>
    %9 = vector.shape_cast %8 : vector<1x64x256xf32> to vector<64x256xf32>
    %10 = vector.shape_cast %7 : vector<64x256xf32> to vector<1x64x256xf32>
    tpu.vector_store %arg5[%c0_6, %c0_7, %c0_8], %10 {strides = array<i32>} : memref<1x64x256xf32, #tpu.memory_space<vmem>>, vector<1x64x256xf32>,
    return
  }
  func.func @transform_0(%arg0: i32, %arg1: i32) -> (i32, i32, i32) {
    %c0_i32 = arith.constant 0 : i32
    %c0_i32_0 = arith.constant 0 : i32
    return %arg0, %c0_i32, %arg1 : i32, i32, i32
  }
  func.func @transform_1(%arg0: i32, %arg1: i32) -> (i32, i32) {
    %c0_i32 = arith.constant 0 : i32
    %c0_i32_0 = arith.constant 0 : i32
    %c0_i32_1 = arith.constant 0 : i32
    return %c0_i32, %c0_i32_0 : i32, i32
  }
  func.func @transform_2(%arg0: i32, %arg1: i32) -> (i32, i32) {
    %c0_i32 = arith.constant 0 : i32
    %c0_i32_0 = arith.constant 0 : i32
    %c0_i32_1 = arith.constant 0 : i32
    return %c0_i32, %c0_i32_0 : i32, i32
  }
  func.func @transform_3(%arg0: i32, %arg1: i32) -> (i32, i32, i32) {
    %c0_i32 = arith.constant 0 : i32
    %c0_i32_0 = arith.constant 0 : i32
    return %arg0, %c0_i32, %arg1 : i32, i32, i32
  }
}

</mosaic_0001>

<bundles_post_ra>
// kernel: rpn_forward.1
= control target key start
LH: loop header
LB: loop body
LE: loop exit
PB: predicated region body
PF: predicated region fallthrough
CT: control target
= control target key end

     0   :  { %s747_s12 = smov 0   ;;  %s749_s13 = smov 0   ;;  %s940_s0 = inlined_call_operand.vmem [shape: f32[2,256,256], index: 0, kind: input, shape index: {}]   ;;  %s941_s1 = inlined_call_operand.vmem [shape: bf16[64,256], index: 1, kind: input, shape index: {}]   ;;  %s942_s2 = inlined_call_operand.vmem [shape: f32[64,1], index: 2, kind: input, shape index: {}]   ;;  %s943_s3 = inlined_call_operand.vmem [shape: f32[2,64,256], index: 3, kind: output, shape index: {}]  }
   0x1   :  { %s751_s14 = smov 0  }
   0x2 LB: > { %s25_s15 = sadd.s32 1, %s720_s13  ;;  %p625_p0 = scmp.ge.s32.totalorder %s724_s14, 1  ;;  %s724_s14 = sphi %s751_s14, %s13_s14   ;;  %s720_s13 = sphi %s749_s13, %s945_s13   ;;  %s716_s12 = sphi %s747_s12, %s944_s12  }
   0x3   : > { %p27_p1 = scmp.ge.s32.totalorder %s25_s15, 2  ;;  %p158_p2 = scmp.lt.s32.totalorder %s724_s14, 3 }
   0x5   : > { %s947_s15 = smov (%p27_p1, %s25_s15), 0  ;;  %p159_p3 = pnand %p625_p0, %p158_p2 }
   0x6   : > { %p191_p4 = scmp.lt.s32.totalorder (!%p159_p3), %s716_s12, 1 }
   0x7   : > { %162 = sbr.rel (%p159_p3) target bundleno = 243 (0xf3), region = 32 }
   0xc   : > { %s949_s12 = smov (!%p191_p4, %s716_s12), 1  ;;  %v726_v25 = vmov 0  }
   0xd   : > { %s664_s16 = sshll.u32 %s949_s12, 9  ;;  %699 = vset.pattern.permute.xlu0 %v726_v25  ;;  %700 = vset.pattern.permute.xlu1 %v726_v25  ;;  %s665_s22 = sshll.u32 %s949_s12, 7 }
   0xe   : > { %s771_s19 = scalar_lea.vmem %s940_s0, %s664_s16  ;;  %701 = vset.pattern.permute.xlu2 %v726_v25  ;;  %s913_s25 = scalar_lea.vmem %s943_s3, %s665_s22 }
   0xf   : > { %v238_v0 = vld [vmem:[%s771_s19 + $0xe0] sm:$0xff]  ;;  %v240_v1 = vld [vmem:[%s771_s19 + $0xf0] sm:$0xff]  ;;  %v239_v5 = vld [vmem:[%s771_s19 + $0xe8] sm:$0xff] }
  0x10   : > { %v270_v2 = vld [vmem:[%s771_s19 + $0x1e0] sm:$0xff]  ;;  %v288_v3 = vpack.c.bf16 %v240_v1, %v238_v0  ;;  %v272_v4 = vld [vmem:[%s771_s19 + $0x1f0] sm:$0xff]  ;;  %v241_v6 = vld [vmem:[%s771_s19 + $0xf8] sm:$0xff] }
  0x11   : > { %v304_v7 = vpack.c.bf16 %v272_v4, %v270_v2  ;;  %v289_v8 = vpack.c.bf16 %v241_v6, %v239_v5  ;;  %v271_v9 = vld [vmem:[%s771_s19 + $0x1e8] sm:$0xff]  ;;  %v273_v10 = vld [vmem:[%s771_s19 + $0x1f8] sm:$0xff]  ;;  %v234_v11 = vld [vmem:[%s771_s19 + $0xc0] sm:$0xff] }
  0x12   : > { %402 = vmatpush.bf16.msra.mxu0 %v288_v3  ;;  %v305_v12 = vpack.c.bf16 %v273_v10, %v271_v9  ;;  %v236_v13 = vld [vmem:[%s771_s19 + $0xd0] sm:$0xff]  ;;  %v266_v14 = vld [vmem:[%s771_s19 + $0x1c0] sm:$0xff]  ;;  %v235_v18 = vld [vmem:[%s771_s19 + $0xc8] sm:$0xff] }
  0x13   : > { %v268_v15 = vld [vmem:[%s771_s19 + $0x1d0] sm:$0xff]  ;;  %431 = vmatpush.bf16.msra.mxu1 %v304_v7  ;;  %460 = vmatpush.bf16.msra.mxu2 %v289_v8  ;;  %v286_v16 = vpack.c.bf16 %v236_v13, %v234_v11  ;;  %v237_v19 = vld [vmem:[%s771_s19 + $0xd8] sm:$0xff]  ;;  %v267_v20 = vld [vmem:[%s771_s19 + $0x1c8] sm:$0xff] }
  0x14   : > { %v302_v17 = vpack.c.bf16 %v268_v15, %v266_v14  ;;  %489 = vmatpush.bf16.msra.mxu3 %v305_v12  ;;  %v287_v21 = vpack.c.bf16 %v237_v19, %v235_v18  ;;  %v269_v22 = vld [vmem:[%s771_s19 + $0x1d8] sm:$0xff]  ;;  %v230_v23 = vld [vmem:[%s771_s19 + $0xa0] sm:$0xff]  ;;  %v232_v24 = vld [vmem:[%s771_s19 + $0xb0] sm:$0xff] }
  0x15   : > { %v303_v26 = vpack.c.bf16 %v269_v22, %v267_v20  ;;  %v262_v27 = vld [vmem:[%s771_s19 + $0x1a0] sm:$0xff]  ;;  %v264_v28 = vld [vmem:[%s771_s19 + $0x1b0] sm:$0xff]  ;;  %v231_v29 = vld [vmem:[%s771_s19 + $0xa8] sm:$0xff]  ;;  %v284_v30 = vpack.c.bf16 %v232_v24, %v230_v23 }
  0x16   : > { %403 = vmatpush.bf16.msra.mxu0 %v286_v16  ;;  %v233_v31 = vld [vmem:[%s771_s19 + $0xb8] sm:$0xff]  ;;  %v263_v32 = vld [vmem:[%s771_s19 + $0x1a8] sm:$0xff]  ;;  %v300_v34 = vpack.c.bf16 %v264_v28, %v262_v27  ;;  %v226_v36 = vld [vmem:[%s771_s19 + $0x80] sm:$0xff] }
  0x17   : > { %v265_v33 = vld [vmem:[%s771_s19 + $0x1b8] sm:$0xff]  ;;  %432 = vmatpush.bf16.msra.mxu1 %v302_v17  ;;  %461 = vmatpush.bf16.msra.mxu2 %v287_v21  ;;  %v285_v35 = vpack.c.bf16 %v233_v31, %v231_v29  ;;  %v228_v37 = vld [vmem:[%s771_s19 + $0x90] sm:$0xff]  ;;  %v258_v38 = vld [vmem:[%s771_s19 + $0x180] sm:$0xff] }
  0x18   : > { %490 = vmatpush.bf16.msra.mxu3 %v303_v26  ;;  %v301_v39 = vpack.c.bf16 %v265_v33, %v263_v32  ;;  %v260_v40 = vld [vmem:[%s771_s19 + $0x190] sm:$0xff]  ;;  %v227_v41 = vld [vmem:[%s771_s19 + $0x88] sm:$0xff]  ;;  %v229_v42 = vld [vmem:[%s771_s19 + $0x98] sm:$0xff]  ;;  %v282_v45 = vpack.c.bf16 %v228_v37, %v226_v36 }
  0x19   : > { %v259_v43 = vld [vmem:[%s771_s19 + $0x188] sm:$0xff]  ;;  %v261_v44 = vld [vmem:[%s771_s19 + $0x198] sm:$0xff]  ;;  %v298_v46 = vpack.c.bf16 %v260_v40, %v258_v38  ;;  %v283_v47 = vpack.c.bf16 %v229_v42, %v227_v41  ;;  %v222_v48 = vld [vmem:[%s771_s19 + $0x60] sm:$0xff] }
  0x1a   : > { %404 = vmatpush.bf16.msra.mxu0 %v284_v30  ;;  %v224_v49 = vld [vmem:[%s771_s19 + $0x70] sm:$0xff]  ;;  %v254_v50 = vld [vmem:[%s771_s19 + $0x160] sm:$0xff]  ;;  %v299_v51 = vpack.c.bf16 %v261_v44, %v259_v43  ;;  %v223_v53 = vld [vmem:[%s771_s19 + $0x68] sm:$0xff] }
  0x1b   : > { %433 = vmatpush.bf16.msra.mxu1 %v300_v34  ;;  %462 = vmatpush.bf16.msra.mxu2 %v285_v35  ;;  %v256_v52 = vld [vmem:[%s771_s19 + $0x170] sm:$0xff]  ;;  %v225_v54 = vld [vmem:[%s771_s19 + $0x78] sm:$0xff]  ;;  %v255_v55 = vld [vmem:[%s771_s19 + $0x168] sm:$0xff]  ;;  %v280_v57 = vpack.c.bf16 %v224_v49, %v222_v48 }
  0x1c   : > { %491 = vmatpush.bf16.msra.mxu3 %v301_v39  ;;  %v257_v56 = vld [vmem:[%s771_s19 + $0x178] sm:$0xff]  ;;  %v296_v58 = vpack.c.bf16 %v256_v52, %v254_v50  ;;  %v281_v59 = vpack.c.bf16 %v225_v54, %v223_v53  ;;  %v218_v60 = vld [vmem:[%s771_s19 + $0x40] sm:$0xff]  ;;  %v220_v61 = vld [vmem:[%s771_s19 + $0x50] sm:$0xff] }
  0x1d   : > { %v250_v62 = vld [vmem:[%s771_s19 + $0x140] sm:$0xff]  ;;  %v297_v63 = vpack.c.bf16 %v257_v56, %v255_v55  ;;  %v252_v0 = vld [vmem:[%s771_s19 + $0x150] sm:$0xff]  ;;  %v219_v1 = vld [vmem:[%s771_s19 + $0x48] sm:$0xff]  ;;  %v278_v5 = vpack.c.bf16 %v220_v61, %v218_v60 }
  0x1e   : > { %405 = vmatpush.bf16.msra.mxu0 %v282_v45  ;;  %v221_v2 = vld [vmem:[%s771_s19 + $0x58] sm:$0xff]  ;;  %v251_v3 = vld [vmem:[%s771_s19 + $0x148] sm:$0xff]  ;;  %v294_v6 = vpack.c.bf16 %v252_v0, %v250_v62  ;;  %v214_v8 = vld [vmem:[%s771_s19 + $0x20] sm:$0xff] }
  0x1f   : > { %434 = vmatpush.bf16.msra.mxu1 %v298_v46  ;;  %463 = vmatpush.bf16.msra.mxu2 %v283_v47  ;;  %v253_v4 = vld [vmem:[%s771_s19 + $0x158] sm:$0xff]  ;;  %v279_v7 = vpack.c.bf16 %v221_v2, %v219_v1  ;;  %v216_v9 = vld [vmem:[%s771_s19 + $0x30] sm:$0xff]  ;;  %v246_v10 = vld [vmem:[%s771_s19 + $0x120] sm:$0xff] }
  0x20   : > { %492 = vmatpush.bf16.msra.mxu3 %v299_v51  ;;  %v295_v11 = vpack.c.bf16 %v253_v4, %v251_v3  ;;  %v248_v12 = vld [vmem:[%s771_s19 + $0x130] sm:$0xff]  ;;  %v215_v13 = vld [vmem:[%s771_s19 + $0x28] sm:$0xff]  ;;  %v217_v14 = vld [vmem:[%s771_s19 + $0x38] sm:$0xff]  ;;  %v276_v18 = vpack.c.bf16 %v216_v9, %v214_v8 }
  0x21   : > { %v247_v15 = vld [vmem:[%s771_s19 + $0x128] sm:$0xff]  ;;  %v249_v16 = vld [vmem:[%s771_s19 + $0x138] sm:$0xff]  ;;  %v314_v17 = vld [vmem:[%s942_s2] sm:$0xff]  ;;  %v292_v20 = vpack.c.bf16 %v248_v12, %v246_v10  ;;  %v277_v21 = vpack.c.bf16 %v217_v14, %v215_v13 }
  0x22   : > { %406 = vmatpush.bf16.msra.mxu0 %v280_v57  ;;  %v210_v19 = vld [vmem:[%s771_s19] sm:$0xff]  ;;  %324 = vperm.xlu0 %699, %v314_v17   ;;  %v212_v22 = vld [vmem:[%s771_s19 + $0x10] sm:$0xff]  ;;  %v293_v25 = vpack.c.bf16 %v249_v16, %v247_v15  ;;  %v211_v27 = vld [vmem:[%s771_s19 + $0x8] sm:$0xff] }
  0x23   : > { %435 = vmatpush.bf16.msra.mxu1 %v296_v58  ;;  %464 = vmatpush.bf16.msra.mxu2 %v281_v59  ;;  %v242_v23 = vld [vmem:[%s771_s19 + $0x100] sm:$0xff]  ;;  %v316_v24 = vld [vmem:[%s942_s2 + $0x10] sm:$0xff]  ;;  %v213_v28 = vld [vmem:[%s771_s19 + $0x18] sm:$0xff]  ;;  %v274_v31 = vpack.c.bf16 %v212_v22, %v210_v19 }
  0x24   : > { %493 = vmatpush.bf16.msra.mxu3 %v297_v63  ;;  %v244_v26 = vld [vmem:[%s771_s19 + $0x110] sm:$0xff]  ;;  %334 = vperm.xlu1 %700, %v316_v24   ;;  %v243_v29 = vld [vmem:[%s771_s19 + $0x108] sm:$0xff]  ;;  %v245_v30 = vld [vmem:[%s771_s19 + $0x118] sm:$0xff]  ;;  %v275_v35 = vpack.c.bf16 %v213_v28, %v211_v27 }
  0x25   : > { %v632_v32 = vld [vmem:[%s941_s1] sm:$0xf]  ;;  %v667_v33 = vld [vmem:[%s941_s1 + $0x4] sm:$0xf0]  ;;  %v290_v34 = vpack.c.bf16 %v244_v26, %v242_v23  ;;  %v666_v36 = vld [vmem:[%s941_s1 + $0x4] sm:$0xf]  ;;  %v291_v39 = vpack.c.bf16 %v245_v30, %v243_v29 }
  0x26   : > { %407 = vmatpush.bf16.msra.mxu0 %v278_v5  ;;  %v634_v37 = vld [vmem:[%s941_s1 + $0x8] sm:$0xf0]  ;;  %v633_v40 = vor.u32 %v667_v33, %v632_v32  ;;  %v317_v42 = vld [vmem:[%s942_s2 + $0x18] sm:$0xff]  ;;  %v640_v43 = vld [vmem:[%s941_s1 + $0x10] sm:$0xf] }
  0x27   : > { %436 = vmatpush.bf16.msra.mxu1 %v294_v6  ;;  %465 = vmatpush.bf16.msra.mxu2 %v279_v7  ;;  %v315_v38 = vld [vmem:[%s942_s2 + $0x8] sm:$0xff]  ;;  %v637_v41 = vor.u32 %v666_v36, %v634_v37  ;;  %v669_v44 = vld [vmem:[%s941_s1 + $0x14] sm:$0xf0]  ;;  %v668_v45 = vld [vmem:[%s941_s1 + $0x14] sm:$0xf] }
  0x28   : > { %494 = vmatpush.bf16.msra.mxu3 %v295_v11  ;;  %v642_v46 = vld [vmem:[%s941_s1 + $0x18] sm:$0xf0]  ;;  %v641_v47 = vor.u32 %v669_v44, %v640_v43  ;;  %v320_v50 = vld [vmem:[%s942_s2 + $0x30] sm:$0xff]  ;;  %v318_v51 = vld [vmem:[%s942_s2 + $0x20] sm:$0xff] }
  0x29   : > { %v645_v48 = vor.u32 %v668_v45, %v642_v46  ;;  %v321_v49 = vld [vmem:[%s942_s2 + $0x38] sm:$0xff]  ;;  %344 = vperm.xlu2 %701, %v318_v51   ;;  %v648_v52 = vld [vmem:[%s941_s1 + $0x20] sm:$0xf]  ;;  %v671_v53 = vld [vmem:[%s941_s1 + $0x24] sm:$0xf0] }
  0x2a   : > { %408 = vmatpush.bf16.msra.mxu0 %v276_v18  ;;  %329 = vperm.xlu0 %699, %v315_v38   ;;  %v319_v54 = vld [vmem:[%s942_s2 + $0x28] sm:$0xff]  ;;  %v670_v55 = vld [vmem:[%s941_s1 + $0x24] sm:$0xf]  ;;  %v649_v57 = vor.u32 %v671_v53, %v648_v52  ;;  %v656_v59 = vld [vmem:[%s941_s1 + $0x30] sm:$0xf] }
  0x2b   : > { %437 = vmatpush.bf16.msra.mxu1 %v292_v20  ;;  %466 = vmatpush.bf16.msra.mxu2 %v277_v21  ;;  %v650_v56 = vld [vmem:[%s941_s1 + $0x28] sm:$0xf0]  ;;  %v673_v60 = vld [vmem:[%s941_s1 + $0x34] sm:$0xf0]  ;;  %v672_v61 = vld [vmem:[%s941_s1 + $0x34] sm:$0xf] }
  0x2c   : > { %495 = vmatpush.bf16.msra.mxu3 %v293_v25  ;;  %339 = vperm.xlu1 %700, %v317_v42   ;;  %v653_v58 = vor.u32 %v670_v55, %v650_v56  ;;  %v658_v62 = vld [vmem:[%s941_s1 + $0x38] sm:$0xf0]  ;;  %v657_v63 = vor.u32 %v673_v60, %v656_v59 }
  0x2d   : > { %v661_v0 = vor.u32 %v672_v61, %v658_v62 }
  0x2e   : > { %409 = vmatpush.bf16.msra.mxu0 %v274_v31 }
  0x2f   : > { %438 = vmatpush.bf16.msra.mxu1 %v290_v34  ;;  %467 = vmatpush.bf16.msra.mxu2 %v275_v35 }
  0x30   : > { %496 = vmatpush.bf16.msra.mxu3 %v291_v39 }
  0x31   : > { %410 = vmatmul.bf16.vlgmr.msra.gmra.mxu0 %v633_v40  ;;  %349 = vperm.xlu2 %701, %v319_v54  }
  0x32   : > { %439 = vmatmul.bf16.vlgmr.msra.gmra.mxu1 %v637_v41  ;;  %468 = vmatmul.bf16.vlgmr.msra.gmra.mxu2 %v633_v40 }
  0x33   : > { %497 = vmatmul.bf16.vlgmr.msra.gmra.mxu3 %v637_v41  ;;  %354 = vperm.xlu0 %699, %v320_v50  }
  0x34   : > { %359 = vperm.xlu1 %700, %v321_v49  }
  0x41   : > { %415 = vmatmul.bf16.gmra.mxu0 %v641_v47 }
  0x42   : > { %444 = vmatmul.bf16.gmra.mxu1 %v645_v48  ;;  %473 = vmatmul.bf16.gmra.mxu2 %v641_v47 }
  0x43   : > { %502 = vmatmul.bf16.gmra.mxu3 %v645_v48 }
  0x51   : > { %420 = vmatmul.bf16.gmra.mxu0 %v649_v57 }
  0x52   : > { %449 = vmatmul.bf16.gmra.mxu1 %v653_v58  ;;  %478 = vmatmul.bf16.gmra.mxu2 %v649_v57 }
  0x53   : > { %507 = vmatmul.bf16.gmra.mxu3 %v653_v58 }
  0x61   : > { %425 = vmatmul.bf16.gmra.mxu0 %v657_v63 }
  0x62   : > { %454 = vmatmul.bf16.gmra.mxu1 %v661_v0  ;;  %483 = vmatmul.bf16.gmra.mxu2 %v657_v63 }
  0x63   : > { %512 = vmatmul.bf16.gmra.mxu3 %v661_v0 }
  0x83   : > { %v345_v33 = vpop.permute.xlu2 %344 }
  0x8b   : > { %v350_v42 = vpop.permute.xlu2 %349 }
  0x94   : > { %v325_v1 = vpop.permute.xlu0 %324 }
  0x96   : > { %v335_v15 = vpop.permute.xlu1 %334 }
  0x9c   : > { %v330_v6 = vpop.permute.xlu0 %329 }
  0x9e   : > { %v340_v24 = vpop.permute.xlu1 %339 }
  0xa5   : > { %v355_v51 = vpop.permute.xlu0 %354 }
  0xa6   : > { %v360_v60 = vpop.permute.xlu1 %359 }
  0xae   : > { %v411_v2 = vpop.f32.mrf.mxu0 }
  0xaf   : > { %v412_v3 = vadd.f32 %v411_v2, %v325_v1  ;;  %v440_v4 = vpop.f32.mrf.mxu1 }
  0xb1   : > { %v441_v5 = vadd.f32 %v440_v4, %v412_v3 }
  0xb3   : > { %518 = vst [vmem:[%s913_s25] sm:$0xff] %v441_v5 }
  0xb5   : > { %v469_v7 = vpop.f32.mrf.mxu2 }
  0xb6   : > { %v470_v8 = vadd.f32 %v469_v7, %v325_v1  ;;  %v498_v9 = vpop.f32.mrf.mxu3  ;;  %v413_v10 = vpop.f32.mrf.mxu0 }
  0xb7   : > { %v414_v11 = vadd.f32 %v413_v10, %v330_v6  ;;  %v442_v12 = vpop.f32.mrf.mxu1 }
  0xb8   : > { %v499_v13 = vadd.f32 %v498_v9, %v470_v8 }
  0xb9   : > { %v443_v14 = vadd.f32 %v442_v12, %v414_v11 }
  0xba   : > { %519 = vst [vmem:[%s913_s25 + $0x8] sm:$0xff] %v499_v13 }
  0xbb   : > { %520 = vst [vmem:[%s913_s25 + $0x10] sm:$0xff] %v443_v14 }
  0xbd   : > { %v471_v16 = vpop.f32.mrf.mxu2 }
  0xbe   : > { %v472_v17 = vadd.f32 %v471_v16, %v330_v6  ;;  %v500_v18 = vpop.f32.mrf.mxu3  ;;  %v416_v19 = vpop.f32.mrf.mxu0 }
  0xbf   : > { %v417_v20 = vadd.f32 %v416_v19, %v335_v15  ;;  %v445_v21 = vpop.f32.mrf.mxu1 }
  0xc0   : > { %v501_v22 = vadd.f32 %v500_v18, %v472_v17 }
  0xc1   : > { %v446_v23 = vadd.f32 %v445_v21, %v417_v20 }
  0xc2   : > { %521 = vst [vmem:[%s913_s25 + $0x18] sm:$0xff] %v501_v22 }
  0xc3   : > { %522 = vst [vmem:[%s913_s25 + $0x20] sm:$0xff] %v446_v23 }
  0xc5   : > { %v474_v25 = vpop.f32.mrf.mxu2 }
  0xc6   : > { %v475_v26 = vadd.f32 %v474_v25, %v335_v15  ;;  %v503_v27 = vpop.f32.mrf.mxu3  ;;  %v418_v28 = vpop.f32.mrf.mxu0 }
  0xc7   : > { %v419_v29 = vadd.f32 %v418_v28, %v340_v24  ;;  %v447_v30 = vpop.f32.mrf.mxu1 }
  0xc8   : > { %v504_v31 = vadd.f32 %v503_v27, %v475_v26 }
  0xc9   : > { %v448_v32 = vadd.f32 %v447_v30, %v419_v29 }
  0xca   : > { %523 = vst [vmem:[%s913_s25 + $0x28] sm:$0xff] %v504_v31 }
  0xcb   : > { %524 = vst [vmem:[%s913_s25 + $0x30] sm:$0xff] %v448_v32 }
  0xcd   : > { %v476_v34 = vpop.f32.mrf.mxu2 }
  0xce   : > { %v477_v35 = vadd.f32 %v476_v34, %v340_v24  ;;  %v505_v36 = vpop.f32.mrf.mxu3  ;;  %v421_v37 = vpop.f32.mrf.mxu0 }
  0xcf   : > { %v422_v38 = vadd.f32 %v421_v37, %v345_v33  ;;  %v450_v39 = vpop.f32.mrf.mxu1 }
  0xd0   : > { %v506_v40 = vadd.f32 %v505_v36, %v477_v35 }
  0xd1   : > { %v451_v41 = vadd.f32 %v450_v39, %v422_v38 }
  0xd2   : > { %525 = vst [vmem:[%s913_s25 + $0x38] sm:$0xff] %v506_v40 }
  0xd3   : > { %526 = vst [vmem:[%s913_s25 + $0x40] sm:$0xff] %v451_v41 }
  0xd5   : > { %v479_v43 = vpop.f32.mrf.mxu2 }
  0xd6   : > { %v480_v44 = vadd.f32 %v479_v43, %v345_v33  ;;  %v508_v45 = vpop.f32.mrf.mxu3  ;;  %v423_v46 = vpop.f32.mrf.mxu0 }
  0xd7   : > { %v424_v47 = vadd.f32 %v423_v46, %v350_v42  ;;  %v452_v48 = vpop.f32.mrf.mxu1 }
  0xd8   : > { %v509_v49 = vadd.f32 %v508_v45, %v480_v44 }
  0xd9   : > { %v453_v50 = vadd.f32 %v452_v48, %v424_v47 }
  0xda   : > { %527 = vst [vmem:[%s913_s25 + $0x48] sm:$0xff] %v509_v49 }
  0xdb   : > { %528 = vst [vmem:[%s913_s25 + $0x50] sm:$0xff] %v453_v50 }
  0xdd   : > { %v481_v52 = vpop.f32.mrf.mxu2 }
  0xde   : > { %v482_v53 = vadd.f32 %v481_v52, %v350_v42  ;;  %v510_v54 = vpop.f32.mrf.mxu3  ;;  %v426_v55 = vpop.f32.mrf.mxu0 }
  0xdf   : > { %v427_v56 = vadd.f32 %v426_v55, %v355_v51  ;;  %v455_v57 = vpop.f32.mrf.mxu1 }
  0xe0   : > { %v511_v58 = vadd.f32 %v510_v54, %v482_v53 }
  0xe1   : > { %v456_v59 = vadd.f32 %v455_v57, %v427_v56 }
  0xe2   : > { %529 = vst [vmem:[%s913_s25 + $0x58] sm:$0xff] %v511_v58 }
  0xe3   : > { %530 = vst [vmem:[%s913_s25 + $0x60] sm:$0xff] %v456_v59 }
  0xe5   : > { %v484_v61 = vpop.f32.mrf.mxu2 }
  0xe6   : > { %v485_v62 = vadd.f32 %v484_v61, %v355_v51  ;;  %v513_v63 = vpop.f32.mrf.mxu3  ;;  %v428_v0 = vpop.f32.mrf.mxu0 }
  0xe7   : > { %v429_v1 = vadd.f32 %v428_v0, %v360_v60  ;;  %v457_v3 = vpop.f32.mrf.mxu1 }
  0xe8   : > { %v514_v2 = vadd.f32 %v513_v63, %v485_v62 }
  0xe9   : > { %v458_v4 = vadd.f32 %v457_v3, %v429_v1 }
  0xea   : > { %531 = vst [vmem:[%s913_s25 + $0x68] sm:$0xff] %v514_v2 }
  0xeb   : > { %532 = vst [vmem:[%s913_s25 + $0x70] sm:$0xff] %v458_v4 }
  0xed   : > { %v486_v5 = vpop.f32.mrf.mxu2 }
  0xee   : > { %v487_v6 = vadd.f32 %v486_v5, %v360_v60  ;;  %v515_v7 = vpop.f32.mrf.mxu3 }
  0xf0   : > { %v516_v8 = vadd.f32 %v515_v7, %v487_v6 }
  0xf2   : > { %533 = vst [vmem:[%s913_s25 + $0x78] sm:$0xff] %v516_v8 }
  0xf3 PF: > { %s13_s14 = sadd.s32 1, %s724_s14   ;;  %s944_s12 = smov %s720_s13 }
  0xf4   : > { %p10_p5 = scmp.ge.s32.totalorder %s13_s14, 4   ;;  %s945_s13 = smov %s947_s15 }
  0xf6   :  { %12 = sbr.rel (!%p10_p5) target bundleno = 2 (0x2), region = 62 }

</bundles_post_ra>
